<compile_context>
chip_gen: v7x
topology: tpu7x:2x2x1
jax: 0.10.0
libtpu: 0.0.40
codegen_flags: <defaults>
</compile_context>

<pallas_src>
import functools

import jax
import jax.numpy as jnp
import numpy as np
from jax.experimental import pallas as pl
from jax.experimental.pallas import tpu as pltpu

EPS = 1e-5  # BatchNorm2d default eps


def _round_up(x, m):
    return (x + m - 1) // m * m


def _conv_tile(xph_ref, w_ref, *, Ho, Wo, KH, KW, Cin_p, dot_dtype):
    """Conv for one image: in-VMEM 9-tap gather + MXU matmuls (f32 accumulate).

    xph_ref: (4, H2, W2, Cin_p) stride-2 phase-decomposed padded input,
             phase index = 2*(row parity) + (col parity).
    w_ref:   (KH*KW*Cin_p, Cout_p), rows ordered (ky, kx, cin).
    returns: (Ho*Wo, Cout_p) float32
    """
    x = xph_ref[...]
    w = w_ref[...].astype(dot_dtype)
    y = None
    for ky in range(KH):
        for kx in range(KW):
            t = ky * KW + kx
            ph = (ky % 2) * 2 + (kx % 2)
            # Contiguous (static) window of the right phase: equals
            # x_pad[2i+ky, 2j+kx, :] for output pixel (i, j).
            col = x[ph, ky // 2:ky // 2 + Ho, kx // 2:kx // 2 + Wo, :]
            col = col.reshape(Ho * Wo, Cin_p).astype(dot_dtype)
            w_tap = w[t * Cin_p:(t + 1) * Cin_p, :]
            part = jnp.dot(col, w_tap, preferred_element_type=jnp.float32)
            y = part if y is None else y + part
    return y


def _stats_kernel(xph_ref, w_ref, sum_ref, sumsq_ref,
                  *, Ho, Wo, KH, KW, Cin_p, dot_dtype):
    """Pass 1: accumulate per-channel sum / sum-of-squares over all rows."""
    y = _conv_tile(xph_ref, w_ref, Ho=Ho, Wo=Wo, KH=KH, KW=KW,
                   Cin_p=Cin_p, dot_dtype=dot_dtype)

    @pl.when(pl.program_id(0) == 0)
    def _init():
        sum_ref[...] = jnp.zeros_like(sum_ref)
        sumsq_ref[...] = jnp.zeros_like(sumsq_ref)

    sum_ref[...] += jnp.sum(y, axis=0, keepdims=True)
    sumsq_ref[...] += jnp.sum(y * y, axis=0, keepdims=True)


def _apply_kernel(xph_ref, w_ref, scale_ref, shift_ref, o_ref,
                  *, Ho, Wo, KH, KW, Cin_p, dot_dtype):
    """Pass 2: recompute conv tile (tiny K), fused BN scale/shift + ReLU."""
    y = _conv_tile(xph_ref, w_ref, Ho=Ho, Wo=Wo, KH=KH, KW=KW,
                   Cin_p=Cin_p, dot_dtype=dot_dtype)
    out = jnp.maximum(y * scale_ref[...] + shift_ref[...], 0.0)
    o_ref[...] = out.astype(o_ref.dtype)


def convblock_forward(x, w, gamma, beta, stride=2, padding=1,
                      dot_dtype=jnp.bfloat16):
    """x: (N, Cin, H, W) NCHW; w: (Cout, Cin, KH, KW) OIHW (PyTorch layouts)."""
    N, Cin, H, W = x.shape
    Cout, _, KH, KW = w.shape
    if stride != 2:
        raise NotImplementedError("phase decomposition specialised to stride=2")

    Ho = (H + 2 * padding - KH) // stride + 1
    Wo = (W + 2 * padding - KW) // stride + 1
    H2 = Ho + (KH - 1) // 2          # phase-array height (covers all taps)
    W2 = Wo + (KW - 1) // 2
    Cin_p = _round_up(Cin, 8)        # sublane-aligned contraction channels
    Cout_p = _round_up(Cout, 128)    # lane-dense output channels
    K = KH * KW * Cin_p
    Mt = Ho * Wo                     # output rows per grid step (per image)
    M = N * Mt

    # ---- glue: layout only, ~1x input traffic (no im2col blow-up in HBM) ----
    x_nhwc = jnp.transpose(x, (0, 2, 3, 1))
    pad_b = 2 * H2 - H - padding
    pad_r = 2 * W2 - W - padding
    x_pad = jnp.pad(x_nhwc,
                    ((0, 0), (padding, pad_b), (padding, pad_r), (0, Cin_p - Cin)))
    # stride-2 phase decomposition: xph[n, 2*p+q, i, j, c] = x_pad[n, 2i+p, 2j+q, c]
    xph = (x_pad.reshape(N, H2, 2, W2, 2, Cin_p)
           .transpose(0, 2, 4, 1, 3, 5)
           .reshape(N, 4, H2, W2, Cin_p)).astype(dot_dtype)

    # PyTorch OIHW weight -> (K, Cout_p); rows ordered (ky, kx, cin) to match the
    # in-kernel tap loop.  Zero-padded channels contribute nothing.
    w_t = jnp.transpose(w, (2, 3, 1, 0))                        # (KH, KW, Cin, Cout)
    w_t = jnp.pad(w_t, ((0, 0), (0, 0), (0, Cin_p - Cin), (0, Cout_p - Cout)))
    w_mat = w_t.reshape(K, Cout_p).astype(dot_dtype)

    xph_spec = pl.BlockSpec((None, 4, H2, W2, Cin_p), lambda n: (n, 0, 0, 0, 0))
    w_spec = pl.BlockSpec((K, Cout_p), lambda n: (0, 0))
    vec_spec = pl.BlockSpec((1, Cout_p), lambda n: (0, 0))
    kargs = dict(Ho=Ho, Wo=Wo, KH=KH, KW=KW, Cin_p=Cin_p, dot_dtype=dot_dtype)

    # ---- pass 1: batch statistics (per-channel sum, sum of squares) ----
    ysum, ysq = pl.pallas_call(
        functools.partial(_stats_kernel, **kargs),
        out_shape=(jax.ShapeDtypeStruct((1, Cout_p), jnp.float32),
                   jax.ShapeDtypeStruct((1, Cout_p), jnp.float32)),
        grid_spec=pltpu.PrefetchScalarGridSpec(
            num_scalar_prefetch=0,
            grid=(N,),
            in_specs=[xph_spec, w_spec],
            out_specs=[vec_spec, vec_spec],
        ),
        compiler_params=pltpu.CompilerParams(
            dimension_semantics=("arbitrary",)),   # grid axis carries the BN reduction
    )(xph, w_mat)

    # Fold BN (training-mode, biased variance) into per-channel scale/shift.
    # Accumulators stay f32 even when the MXU runs bf16.
    mean = ysum[0] / M
    var = jnp.maximum(ysq[0] / M - mean * mean, 0.0)
    gamma_p = jnp.pad(gamma.astype(jnp.float32), (0, Cout_p - Cout))
    beta_p = jnp.pad(beta.astype(jnp.float32), (0, Cout_p - Cout))
    scale_v = gamma_p * jax.lax.rsqrt(var + EPS)
    shift_v = beta_p - mean * scale_v
    scale = scale_v.reshape(1, Cout_p)
    shift = shift_v.reshape(1, Cout_p)

    # ---- pass 2: recompute conv tile, fused BN + ReLU, lane-dense store ----
    out = pl.pallas_call(
        functools.partial(_apply_kernel, **kargs),
        out_shape=jax.ShapeDtypeStruct((M, Cout_p), x.dtype),
        grid_spec=pltpu.PrefetchScalarGridSpec(
            num_scalar_prefetch=0,
            grid=(N,),
            in_specs=[xph_spec, w_spec, vec_spec, vec_spec],
            out_specs=pl.BlockSpec((Mt, Cout_p), lambda n: (n, 0)),
        ),
        compiler_params=pltpu.CompilerParams(
            dimension_semantics=("parallel",)),    # independent tiles -> v7x megacore
    )(xph, w_mat, scale, shift)

    out = out[:, :Cout].reshape(N, Ho, Wo, Cout)
    return jnp.transpose(out, (0, 3, 1, 2))        # back to NCHW


def convblock_reference(x, w, gamma, beta, stride=2, padding=1):
    """Pure-JAX (XLA) reference for validation."""
    y = jax.lax.conv_general_dilated(
        x, w, window_strides=(stride, stride),
        padding=((padding, padding), (padding, padding)),
        dimension_numbers=("NCHW", "OIHW", "NCHW"),
        precision=jax.lax.Precision.HIGHEST)
    mean = jnp.mean(y, axis=(0, 2, 3), keepdims=True)
    var = jnp.mean((y - mean) ** 2, axis=(0, 2, 3), keepdims=True)
    y_hat = (y - mean) * jax.lax.rsqrt(var + EPS)
    out = y_hat * gamma.reshape(1, -1, 1, 1) + beta.reshape(1, -1, 1, 1)
    return jnp.maximum(out, 0.0)


if __name__ == "__main__":
    # Small shapes consistent with the module's forward.
    N, Cin, H, W = 2, 4, 16, 16
    Cout, KH, KW = 8, 3, 3

    key = jax.random.PRNGKey(0)
    kx_key, kw_key = jax.random.split(key)

    x = jax.random.normal(kx_key, (N, Cin, H, W), dtype=jnp.float32)

    # Deterministic kaiming_normal_-style conv weight (fan_in mode, gain=sqrt(2)).
    fan_in = Cin * KH * KW
    w = jax.random.normal(kw_key, (Cout, Cin, KH, KW), dtype=jnp.float32) \
        * np.sqrt(2.0 / fan_in)

    # Fresh BatchNorm2d parameters: weight=1, bias=0.
    gamma = jnp.ones((Cout,), dtype=jnp.float32)
    beta = jnp.zeros((Cout,), dtype=jnp.float32)

    ref = jax.block_until_ready(convblock_reference(x, w, gamma, beta))

    # f32 MXU path: tight correctness check of the kernel logic.
    out_f32 = jax.block_until_ready(
        convblock_forward(x, w, gamma, beta, dot_dtype=jnp.float32))
    np.testing.assert_allclose(np.asarray(out_f32), np.asarray(ref),
                               rtol=1e-4, atol=1e-4)

    # bf16 MXU path (default; the fast path on v6e/v7x): looser tolerance.
    out_bf16 = jax.block_until_ready(convblock_forward(x, w, gamma, beta))
    np.testing.assert_allclose(np.asarray(out_bf16), np.asarray(ref),
                               rtol=5e-2, atol=5e-2)

    print("KERNEL_OK")
</pallas_src>

<mosaic_0001>
module attributes {stable_mosaic.version = 11 : i64} {
  func.func @_stats_kernel(%arg0: i32, %arg1: memref<1x4x9x9x8xf32, #tpu.memory_space<vmem>>, %arg2: memref<72x128xf32, #tpu.memory_space<vmem>>, %arg3: memref<1x128xf32, #tpu.memory_space<vmem>>, %arg4: memref<1x128xf32, #tpu.memory_space<vmem>>) attributes {dimension_semantics = [#tpu.dimension_semantics<arbitrary>], iteration_bounds = array<i64: 2>, scalar_prefetch = 0 : i64, scratch_operands = 0 : i64, tpu.core_type = #tpu.core_type<tc>, window_params = [{transform_indices = @transform_0, window_bounds = array<i64: 1, 4, 9, 9, 8>}, {pipeline_mode = #tpu.pipeline_mode<synchronous>, transform_indices = @transform_1, window_bounds = array<i64: 72, 128>}, {pipeline_mode = #tpu.pipeline_mode<synchronous>, transform_indices = @transform_2, window_bounds = array<i64: 1, 128>}, {pipeline_mode = #tpu.pipeline_mode<synchronous>, transform_indices = @transform_3, window_bounds = array<i64: 1, 128>}]} {
    %c0 = arith.constant 0 : index
    %c0_0 = arith.constant 0 : index
    %c0_1 = arith.constant 0 : index
    %c0_2 = arith.constant 0 : index
    %c0_3 = arith.constant 0 : index
    %0 = vector.load %arg1[%c0, %c0_0, %c0_1, %c0_2, %c0_3] : memref<1x4x9x9x8xf32, #tpu.memory_space<vmem>>, vector<1x4x9x9x8xf32>
    %1 = vector.shape_cast %0 : vector<1x4x9x9x8xf32> to vector<4x9x9x8xf32>
    %c0_4 = arith.constant 0 : index
    %c0_5 = arith.constant 0 : index
    %2 = vector.load %arg2[%c0_4, %c0_5] : memref<72x128xf32, #tpu.memory_space<vmem>>, vector<72x128xf32>
    %3 = vector.extract_strided_slice %1 {offsets = [0, 0, 0, 0], sizes = [1, 8, 8, 8], strides = [1, 1, 1, 1]} : vector<4x9x9x8xf32> to vector<1x8x8x8xf32>
    %4 = vector.shape_cast %3 : vector<1x8x8x8xf32> to vector<8x8x8xf32>
    %5 = vector.shape_cast %4 : vector<8x8x8xf32> to vector<64x8xf32>
    %6 = vector.extract_strided_slice %2 {offsets = [0, 0], sizes = [8, 128], strides = [1, 1]} : vector<72x128xf32> to vector<8x128xf32>
    %cst = arith.constant dense<0.000000e+00> : vector<64x128xf32>
    %7 = tpu.matmul %5, %6, %cst {dimension_numbers = #tpu.dot_dimension_numbers<[1], [0], [0], [1], [0, 0, 1, 1], [], []>} : vector<64x8xf32>, vector<8x128xf32>, vector<64x128xf32> -> vector<64x128xf32>
    %8 = vector.extract_strided_slice %1 {offsets = [1, 0, 0, 0], sizes = [1, 8, 8, 8], strides = [1, 1, 1, 1]} : vector<4x9x9x8xf32> to vector<1x8x8x8xf32>
    %9 = vector.shape_cast %8 : vector<1x8x8x8xf32> to vector<8x8x8xf32>
    %10 = vector.shape_cast %9 : vector<8x8x8xf32> to vector<64x8xf32>
    %11 = vector.extract_strided_slice %2 {offsets = [8, 0], sizes = [8, 128], strides = [1, 1]} : vector<72x128xf32> to vector<8x128xf32>
    %cst_6 = arith.constant dense<0.000000e+00> : vector<64x128xf32>
    %12 = tpu.matmul %10, %11, %cst_6 {dimension_numbers = #tpu.dot_dimension_numbers<[1], [0], [0], [1], [0, 0, 1, 1], [], []>} : vector<64x8xf32>, vector<8x128xf32>, vector<64x128xf32> -> vector<64x128xf32>
    %13 = arith.addf %7, %12 : vector<64x128xf32>
    %14 = vector.extract_strided_slice %1 {offsets = [0, 0, 1, 0], sizes = [1, 8, 8, 8], strides = [1, 1, 1, 1]} : vector<4x9x9x8xf32> to vector<1x8x8x8xf32>
    %15 = vector.shape_cast %14 : vector<1x8x8x8xf32> to vector<8x8x8xf32>
    %16 = vector.shape_cast %15 : vector<8x8x8xf32> to vector<64x8xf32>
    %17 = vector.extract_strided_slice %2 {offsets = [16, 0], sizes = [8, 128], strides = [1, 1]} : vector<72x128xf32> to vector<8x128xf32>
    %cst_7 = arith.constant dense<0.000000e+00> : vector<64x128xf32>
    %18 = tpu.matmul %16, %17, %cst_7 {dimension_numbers = #tpu.dot_dimension_numbers<[1], [0], [0], [1], [0, 0, 1, 1], [], []>} : vector<64x8xf32>, vector<8x128xf32>, vector<64x128xf32> -> vector<64x128xf32>
    %19 = arith.addf %13, %18 : vector<64x128xf32>
    %20 = vector.extract_strided_slice %1 {offsets = [2, 0, 0, 0], sizes = [1, 8, 8, 8], strides = [1, 1, 1, 1]} : vector<4x9x9x8xf32> to vector<1x8x8x8xf32>
    %21 = vector.shape_cast %20 : vector<1x8x8x8xf32> to vector<8x8x8xf32>
    %22 = vector.shape_cast %21 : vector<8x8x8xf32> to vector<64x8xf32>
    %23 = vector.extract_strided_slice %2 {offsets = [24, 0], sizes = [8, 128], strides = [1, 1]} : vector<72x128xf32> to vector<8x128xf32>
    %cst_8 = arith.constant dense<0.000000e+00> : vector<64x128xf32>
    %24 = tpu.matmul %22, %23, %cst_8 {dimension_numbers = #tpu.dot_dimension_numbers<[1], [0], [0], [1], [0, 0, 1, 1], [], []>} : vector<64x8xf32>, vector<8x128xf32>, vector<64x128xf32> -> vector<64x128xf32>
    %25 = arith.addf %19, %24 : vector<64x128xf32>
    %26 = vector.extract_strided_slice %1 {offsets = [3, 0, 0, 0], sizes = [1, 8, 8, 8], strides = [1, 1, 1, 1]} : vector<4x9x9x8xf32> to vector<1x8x8x8xf32>
    %27 = vector.shape_cast %26 : vector<1x8x8x8xf32> to vector<8x8x8xf32>
    %28 = vector.shape_cast %27 : vector<8x8x8xf32> to vector<64x8xf32>
    %29 = vector.extract_strided_slice %2 {offsets = [32, 0], sizes = [8, 128], strides = [1, 1]} : vector<72x128xf32> to vector<8x128xf32>
    %cst_9 = arith.constant dense<0.000000e+00> : vector<64x128xf32>
    %30 = tpu.matmul %28, %29, %cst_9 {dimension_numbers = #tpu.dot_dimension_numbers<[1], [0], [0], [1], [0, 0, 1, 1], [], []>} : vector<64x8xf32>, vector<8x128xf32>, vector<64x128xf32> -> vector<64x128xf32>
    %31 = arith.addf %25, %30 : vector<64x128xf32>
    %32 = vector.extract_strided_slice %1 {offsets = [2, 0, 1, 0], sizes = [1, 8, 8, 8], strides = [1, 1, 1, 1]} : vector<4x9x9x8xf32> to vector<1x8x8x8xf32>
    %33 = vector.shape_cast %32 : vector<1x8x8x8xf32> to vector<8x8x8xf32>
    %34 = vector.shape_cast %33 : vector<8x8x8xf32> to vector<64x8xf32>
    %35 = vector.extract_strided_slice %2 {offsets = [40, 0], sizes = [8, 128], strides = [1, 1]} : vector<72x128xf32> to vector<8x128xf32>
    %cst_10 = arith.constant dense<0.000000e+00> : vector<64x128xf32>
    %36 = tpu.matmul %34, %35, %cst_10 {dimension_numbers = #tpu.dot_dimension_numbers<[1], [0], [0], [1], [0, 0, 1, 1], [], []>} : vector<64x8xf32>, vector<8x128xf32>, vector<64x128xf32> -> vector<64x128xf32>
    %37 = arith.addf %31, %36 : vector<64x128xf32>
    %38 = vector.extract_strided_slice %1 {offsets = [0, 1, 0, 0], sizes = [1, 8, 8, 8], strides = [1, 1, 1, 1]} : vector<4x9x9x8xf32> to vector<1x8x8x8xf32>
    %39 = vector.shape_cast %38 : vector<1x8x8x8xf32> to vector<8x8x8xf32>
    %40 = vector.shape_cast %39 : vector<8x8x8xf32> to vector<64x8xf32>
    %41 = vector.extract_strided_slice %2 {offsets = [48, 0], sizes = [8, 128], strides = [1, 1]} : vector<72x128xf32> to vector<8x128xf32>
    %cst_11 = arith.constant dense<0.000000e+00> : vector<64x128xf32>
    %42 = tpu.matmul %40, %41, %cst_11 {dimension_numbers = #tpu.dot_dimension_numbers<[1], [0], [0], [1], [0, 0, 1, 1], [], []>} : vector<64x8xf32>, vector<8x128xf32>, vector<64x128xf32> -> vector<64x128xf32>
    %43 = arith.addf %37, %42 : vector<64x128xf32>
    %44 = vector.extract_strided_slice %1 {offsets = [1, 1, 0, 0], sizes = [1, 8, 8, 8], strides = [1, 1, 1, 1]} : vector<4x9x9x8xf32> to vector<1x8x8x8xf32>
    %45 = vector.shape_cast %44 : vector<1x8x8x8xf32> to vector<8x8x8xf32>
    %46 = vector.shape_cast %45 : vector<8x8x8xf32> to vector<64x8xf32>
    %47 = vector.extract_strided_slice %2 {offsets = [56, 0], sizes = [8, 128], strides = [1, 1]} : vector<72x128xf32> to vector<8x128xf32>
    %cst_12 = arith.constant dense<0.000000e+00> : vector<64x128xf32>
    %48 = tpu.matmul %46, %47, %cst_12 {dimension_numbers = #tpu.dot_dimension_numbers<[1], [0], [0], [1], [0, 0, 1, 1], [], []>} : vector<64x8xf32>, vector<8x128xf32>, vector<64x128xf32> -> vector<64x128xf32>
    %49 = arith.addf %43, %48 : vector<64x128xf32>
    %50 = vector.extract_strided_slice %1 {offsets = [0, 1, 1, 0], sizes = [1, 8, 8, 8], strides = [1, 1, 1, 1]} : vector<4x9x9x8xf32> to vector<1x8x8x8xf32>
    %51 = vector.shape_cast %50 : vector<1x8x8x8xf32> to vector<8x8x8xf32>
    %52 = vector.shape_cast %51 : vector<8x8x8xf32> to vector<64x8xf32>
    %53 = vector.extract_strided_slice %2 {offsets = [64, 0], sizes = [8, 128], strides = [1, 1]} : vector<72x128xf32> to vector<8x128xf32>
    %cst_13 = arith.constant dense<0.000000e+00> : vector<64x128xf32>
    %54 = tpu.matmul %52, %53, %cst_13 {dimension_numbers = #tpu.dot_dimension_numbers<[1], [0], [0], [1], [0, 0, 1, 1], [], []>} : vector<64x8xf32>, vector<8x128xf32>, vector<64x128xf32> -> vector<64x128xf32>
    %55 = arith.addf %49, %54 : vector<64x128xf32>
    %c0_i32 = arith.constant 0 : i32
    %56 = arith.cmpi eq, %arg0, %c0_i32 : i32
    %57 = arith.extui %56 : i1 to i32
    %c0_i32_14 = arith.constant 0 : i32
    %58 = arith.cmpi ne, %57, %c0_i32_14 : i32
    scf.if %58 {
      %cst_25 = arith.constant 0.000000e+00 : f32
      %70 = vector.broadcast %cst_25 : f32 to vector<1x128xf32>
      %c0_26 = arith.constant 0 : index
      %c0_27 = arith.constant 0 : index
      %71 = vector.load %arg3[%c0_26, %c0_27] : memref<1x128xf32, #tpu.memory_space<vmem>>, vector<1x128xf32>
      tpu.vector_store %arg3[%c0_26, %c0_27], %70 {strides = array<i32>} : memref<1x128xf32, #tpu.memory_space<vmem>>, vector<1x128xf32>,
      %cst_28 = arith.constant 0.000000e+00 : f32
      %72 = vector.broadcast %cst_28 : f32 to vector<1x128xf32>
      %c0_29 = arith.constant 0 : index
      %c0_30 = arith.constant 0 : index
      %73 = vector.load %arg4[%c0_29, %c0_30] : memref<1x128xf32, #tpu.memory_space<vmem>>, vector<1x128xf32>
      tpu.vector_store %arg4[%c0_29, %c0_30], %72 {strides = array<i32>} : memref<1x128xf32, #tpu.memory_space<vmem>>, vector<1x128xf32>,
    } else {
    }
    %c0_15 = arith.constant 0 : index
    %c0_16 = arith.constant 0 : index
    %59 = vector.load %arg3[%c0_15, %c0_16] : memref<1x128xf32, #tpu.memory_space<vmem>>, vector<1x128xf32>
    %cst_17 = arith.constant dense<0.000000e+00> : vector<128xf32>
    %60 = vector.multi_reduction <add>, %55, %cst_17 [0] : vector<64x128xf32> to vector<128xf32>
    %61 = vector.shape_cast %60 : vector<128xf32> to vector<1x128xf32>
    %62 = arith.addf %59, %61 : vector<1x128xf32>
    %c0_18 = arith.constant 0 : index
    %c0_19 = arith.constant 0 : index
    %63 = vector.load %arg3[%c0_18, %c0_19] : memref<1x128xf32, #tpu.memory_space<vmem>>, vector<1x128xf32>
    tpu.vector_store %arg3[%c0_18, %c0_19], %62 {strides = array<i32>} : memref<1x128xf32, #tpu.memory_space<vmem>>, vector<1x128xf32>,
    %c0_20 = arith.constant 0 : index
    %c0_21 = arith.constant 0 : index
    %64 = vector.load %arg4[%c0_20, %c0_21] : memref<1x128xf32, #tpu.memory_space<vmem>>, vector<1x128xf32>
    %65 = arith.mulf %55, %55 : vector<64x128xf32>
    %cst_22 = arith.constant dense<0.000000e+00> : vector<128xf32>
    %66 = vector.multi_reduction <add>, %65, %cst_22 [0] : vector<64x128xf32> to vector<128xf32>
    %67 = vector.shape_cast %66 : vector<128xf32> to vector<1x128xf32>
    %68 = arith.addf %64, %67 : vector<1x128xf32>
    %c0_23 = arith.constant 0 : index
    %c0_24 = arith.constant 0 : index
    %69 = vector.load %arg4[%c0_23, %c0_24] : memref<1x128xf32, #tpu.memory_space<vmem>>, vector<1x128xf32>
    tpu.vector_store %arg4[%c0_23, %c0_24], %68 {strides = array<i32>} : memref<1x128xf32, #tpu.memory_space<vmem>>, vector<1x128xf32>,
    return
  }
  func.func @transform_0(%arg0: i32) -> (i32, i32, i32, i32, i32) {
    %c0_i32 = arith.constant 0 : i32
    %c0_i32_0 = arith.constant 0 : i32
    %c0_i32_1 = arith.constant 0 : i32
    %c0_i32_2 = arith.constant 0 : i32
    %c0_i32_3 = arith.constant 0 : i32
    return %arg0, %c0_i32, %c0_i32_0, %c0_i32_1, %c0_i32_2 : i32, i32, i32, i32, i32
  }
  func.func @transform_1(%arg0: i32) -> (i32, i32) {
    %c0_i32 = arith.constant 0 : i32
    %c0_i32_0 = arith.constant 0 : i32
    %c0_i32_1 = arith.constant 0 : i32
    return %c0_i32, %c0_i32_0 : i32, i32
  }
  func.func @transform_2(%arg0: i32) -> (i32, i32) {
    %c0_i32 = arith.constant 0 : i32
    %c0_i32_0 = arith.constant 0 : i32
    %c0_i32_1 = arith.constant 0 : i32
    return %c0_i32, %c0_i32_0 : i32, i32
  }
  func.func @transform_3(%arg0: i32) -> (i32, i32) {
    %c0_i32 = arith.constant 0 : i32
    %c0_i32_0 = arith.constant 0 : i32
    %c0_i32_1 = arith.constant 0 : i32
    return %c0_i32, %c0_i32_0 : i32, i32
  }
}

</mosaic_0001>

<bundles_post_ra>
// kernel: tpu_custom_call.1
= control target key start
LH: loop header
LB: loop body
LE: loop exit
PB: predicated region body
PF: predicated region fallthrough
CT: control target
= control target key end

     0   :  { %9 = vsyncpa [#allocation3], 0  ;;  %s2320_s0 = inlined_call_operand.vmem [shape: f32[2,4,9,9,8], index: 0, kind: input, shape index: {}]   ;;  %s2321_s1 = inlined_call_operand.vmem [shape: f32[72,128], index: 1, kind: input, shape index: {}]   ;;  %s2322_s2 = inlined_call_operand.hbm [shape: f32[1,128], index: 2, kind: output, shape index: {0}]   ;;  %s2323_s3 = inlined_call_operand.hbm [shape: f32[1,128], index: 3, kind: output, shape index: {1}]  }
   0x1   :  { %10 = vsyncpa [#allocation5], 0  ;;  %s2009_s12 = smov 0  }
   0x2 LB: > { %s2015_s13 = sadd.s32 4294967295, %s1984_s12   ;;  %p1540_p0 = scmp.ge.s32.totalorder %s1984_s12, 1  ;;  %s1984_s12 = sphi %s2009_s12, %s16_s12  }
   0x3   : > { %p132_p1 = scmp.lt.s32.totalorder %s1984_s12, 3 }
   0x5   : > { %p133_p2 = pnand %p1540_p0, %p132_p1 }
   0x6   : > { %v208_v0 = vld [vmem:[%s2321_s1 + $0x8] sm:$0xff] (!%p133_p2)  ;;  %v2025_v1 = vld [vmem:[%s2321_s1 + $0x20] sm:$0xff] (!%p133_p2)  ;;  %p151_p3 = scmp.lt.s32.totalorder (!%p133_p2), %s2015_s13, 1  ;;  %vm216_vm0 = vcmask (!%p133_p2), 64512   ;;  %v213_v11 = vld [vmem:[%s2321_s1 + $0x30] sm:$0xff] (!%p133_p2)  ;;  %vm483_vm1 = vcmask (!%p133_p2), 1046528  }
   0x7   : > { %136 = sbr.rel (%p133_p2) target bundleno = 370 (0x172), region = 28  ;;  %v207_v2 = vld [vmem:[%s2321_s1] sm:$0xff] (!%p133_p2)  ;;  %1702 = vmatprep.subr.mxu1 (!%p133_p2), %v208_v0  ;;  %1758 = vmatprep.subr.mxu0 (!%p133_p2), %v2025_v1  ;;  %v212_v3 = vld [vmem:[%s2321_s1 + $0x28] sm:$0xff] (!%p133_p2)  ;;  %v2066_v12 = vld [vmem:[%s2321_s1 + $0x10] sm:$0xff] (!%p133_p2)  ;;  %p1614_p4 = scmp.ne.s32.totalorder (!%p133_p2), %s2015_s13, 0 }
   0x8   : > { %1703 = vmatpush3.msra.mxu1 (!%p133_p2), %v208_v0  ;;  %1759 = vmatpush3.msra.mxu0 (!%p133_p2), %v2025_v1  ;;  %v214_v42 = vld [vmem:[%s2321_s1 + $0x38] sm:$0xff] (!%p133_p2) }
   0x9   : > { %1716 = vmatprep.subr.mxu1 (!%p133_p2), %v207_v2  ;;  %1772 = vmatprep.subr.mxu0 (!%p133_p2), %v212_v3  ;;  %v210_v61 = vld [vmem:[%s2321_s1 + $0x18] sm:$0xff] (!%p133_p2) }
   0xe   : > { %s152_s22 = scalar_select %p151_p3, %s2015_s13, 1 }
  0x10   : > { %s1894_s23 = smul.u32 576, %s152_s22 }
  0x12   : > { %s2040_s26 = scalar_lea.vmem %s2320_s0, %s1894_s23 }
  0x13   : > { %v174_v4 = vld [vmem:[%s2040_s26 + $0x90] sm:$0xff]  ;;  %v2045_v6 = vld [vmem:[%s2040_s26 + $0xa0] sm:$0xff]  ;;  %v184_v15 = vld [vmem:[%s2040_s26 + $0x128] sm:$0x1] }
  0x14   : > { %v199_v5 = vld [vmem:[%s2040_s26 + $0x1b0] sm:$0xff]  ;;  %1704 = vmatprep.mubr.msk.f32.mxu1 %vm216_vm0, %v174_v4  ;;  %v200_v7 = vld [vmem:[%s2040_s26 + $0x1c0] sm:$0xff]  ;;  %v920_v18 = vrot.slane %v184_v15, 1  ;;  %v186_v20 = vld [vmem:[%s2040_s26 + $0x138] sm:$0x1] }
  0x15   : > { %1760 = vmatprep.mubr.msk.f32.mxu0 %vm216_vm0, %v199_v5  ;;  %v2051_v8 = vld [vmem:[%s2040_s26 + $0xb0] sm:$0xff]  ;;  %1705 = vmatmul.mubr.msk.f32.vlgmr.msra.gmra.mrb[0].mxu1 %vm216_vm0, %v2045_v6  ;;  %v2058_v10 = vld [vmem:[%s2040_s26 + $0xc0] sm:$0xff]  ;;  %v923_v22 = vrot.slane %v186_v20, 1  ;;  %v188_v24 = vld [vmem:[%s2040_s26 + $0x148] sm:$0x1] }
  0x16   : > { %v201_v9 = vld [vmem:[%s2040_s26 + $0x1d0] sm:$0xff]  ;;  %1761 = vmatmul.mubr.msk.f32.vlgmr.msra.gmra.mrb[0].mxu0 %vm216_vm0, %v200_v7  ;;  %1717 = vmatpush3.msra.mxu1 %v207_v2  ;;  %v202_v13 = vld [vmem:[%s2040_s26 + $0x1e0] sm:$0xff]  ;;  %v926_v27 = vrot.slane %v188_v24, 1  ;;  %v190_v29 = vld [vmem:[%s2040_s26 + $0x158] sm:$0x1] }
  0x17   : > { %1773 = vmatpush3.msra.mxu0 %v212_v3  ;;  %v2070_v14 = vld [vmem:[%s2040_s26 + $0x120] sm:$0xff]  ;;  %1707 = vmatprep.mubr.msk.f32.mxu1 %vm216_vm0, %v2051_v8  ;;  %v2077_v16 = vld [vmem:[%s2040_s26 + $0xd0] sm:$0xff]  ;;  %v929_v33 = vrot.slane %v190_v29, 1  ;;  %v192_v35 = vld [vmem:[%s2040_s26 + $0x168] sm:$0x1] }
  0x18   : > { %1763 = vmatprep.mubr.msk.f32.mxu0 %vm216_vm0, %v201_v9  ;;  %v919_v17 = vrot.slane %v2070_v14, 1  ;;  %v2081_v19 = vld [vmem:[%s2040_s26 + $0x130] sm:$0xff]  ;;  %1786 = vmatprep.subr.mxu0 %v213_v11  ;;  %v2086_v23 = vld [vmem:[%s2040_s26 + $0x140] sm:$0xff]  ;;  %v932_v38 = vrot.slane %v192_v35, 1  ;;  %v194_v40 = vld [vmem:[%s2040_s26 + $0x178] sm:$0x1] }
  0x19   : > { %v922_v21 = vrot.slane %v2081_v19, 1  ;;  %1730 = vmatprep.subr.mxu1 %v2066_v12  ;;  %1708 = vmatmul.mubr.msk.f32.gmra.mrb[2].mxu1 %vm216_vm0, %v2058_v10  ;;  %v925_v26 = vrot.slane %v2086_v23, 1  ;;  %v2096_v28 = vld [vmem:[%s2040_s26 + $0x150] sm:$0xff]  ;;  %v2103_v30 = vld [vmem:[%s2040_s26 + $0xe0] sm:$0xff]  ;;  %v196_v44 = vld [vmem:[%s2040_s26 + $0x188] sm:$0x1] }
  0x1a   : > { %1764 = vmatmul.mubr.msk.f32.gmra.mrb[2].mxu0 %vm216_vm0, %v202_v13  ;;  %v921_v25 = vsel %vm483_vm1, %v919_v17, %v920_v18  ;;  %1710 = vmatprep.mubr.msk.f32.mxu1 %vm216_vm0, %v2077_v16  ;;  %v928_v32 = vrot.slane %v2096_v28, 1  ;;  %v2108_v34 = vld [vmem:[%s2040_s26 + $0x160] sm:$0xff]  ;;  %v2112_v36 = vld [vmem:[%s2040_s26 + $0xf0] sm:$0xff]  ;;  %v935_v48 = vrot.slane %v194_v40, 1  ;;  %v198_v52 = vld [vmem:[%s2040_s26 + $0x198] sm:$0x1] }
  0x1b   : > { %1774 = vmatprep.mubr.msk.f32.mxu0 %vm216_vm0, %v921_v25  ;;  %v924_v31 = vsel %vm483_vm1, %v922_v21, %v923_v22  ;;  %v931_v37 = vrot.slane %v2108_v34, 1  ;;  %v2116_v39 = vld [vmem:[%s2040_s26 + $0x170] sm:$0xff]  ;;  %v927_v41 = vsel %vm483_vm1, %v925_v26, %v926_v27  ;;  %v2127_v43 = vld [vmem:[%s2040_s26 + $0x180] sm:$0xff]  ;;  %v938_v54 = vrot.slane %v196_v44, 1  ;;  %v157_v2 = vld [vmem:[%s2040_s26 + $0x8] sm:$0x1] }
  0x1c   : > { %v2133_v45 = vld [vmem:[%s2040_s26 + $0x100] sm:$0xff]  ;;  %v930_v46 = vsel %vm483_vm1, %v928_v32, %v929_v33  ;;  %v934_v47 = vrot.slane %v2116_v39, 1  ;;  %v2141_v51 = vld [vmem:[%s2040_s26 + $0x190] sm:$0xff]  ;;  %v937_v53 = vrot.slane %v2127_v43, 1  ;;  %v941_v58 = vrot.slane %v198_v52, 1 }
  0x1d   : > { %1711 = vmatmul.mubr.msk.f32.gmra.mrb[4].mxu1 %vm216_vm0, %v2103_v30  ;;  %v156_v49 = vld [vmem:[%s2040_s26] sm:$0xff]  ;;  %v933_v50 = vsel %vm483_vm1, %v931_v37, %v932_v38  ;;  %v158_v55 = vld [vmem:[%s2040_s26 + $0x10] sm:$0xff]  ;;  %v940_v57 = vrot.slane %v2141_v51, 1  ;;  %v485_v7 = vrot.slane %v157_v2, 1  ;;  %v159_v9 = vld [vmem:[%s2040_s26 + $0x18] sm:$0x1] }
  0x1e   : > { %1775 = vmatmul.mubr.msk.f32.vlgmr.msra.gmra.mrb[0].mxu0 %vm216_vm0, %v924_v31  ;;  %1713 = vmatprep.mubr.msk.f32.mxu1 %vm216_vm0, %v2112_v36  ;;  %v936_v56 = vsel %vm483_vm1, %v934_v47, %v935_v48  ;;  %v160_v59 = vld [vmem:[%s2040_s26 + $0x20] sm:$0xff]  ;;  %v939_v60 = vsel %vm483_vm1, %v937_v53, %v938_v54  ;;  %v162_v62 = vld [vmem:[%s2040_s26 + $0x30] sm:$0xff]  ;;  %v484_v4 = vrot.slane %v156_v49, 1  ;;  %v487_v13 = vrot.slane %v158_v55, 1  ;;  %v163_v22 = vld [vmem:[%s2040_s26 + $0x38] sm:$0x1] }
  0x1f   : > { %1787 = vmatpush3.msra.mxu0 %v213_v11  ;;  %1777 = vmatprep.mubr.msk.f32.mxu0 %vm216_vm0, %v927_v41  ;;  %v942_v63 = vsel %vm483_vm1, %v940_v57, %v941_v58  ;;  %v164_v0 = vld [vmem:[%s2040_s26 + $0x40] sm:$0xff]  ;;  %v166_v3 = vld [vmem:[%s2040_s26 + $0x50] sm:$0xff]  ;;  %v161_v11 = vld [vmem:[%s2040_s26 + $0x28] sm:$0x1]  ;;  %v488_v17 = vrot.slane %v159_v9, 1  ;;  %v490_v18 = vrot.slane %v160_v59, 1 }
  0x20   : > { %1800 = vmatprep.subr.mxu0 %v214_v42  ;;  %v168_v5 = vld [vmem:[%s2040_s26 + $0x60] sm:$0xff]  ;;  %v170_v15 = vld [vmem:[%s2040_s26 + $0x70] sm:$0xff]  ;;  %v486_v20 = vsel %vm483_vm1, %v484_v4, %v485_v7  ;;  %v491_v21 = vrot.slane %v161_v11, 1  ;;  %v165_v24 = vld [vmem:[%s2040_s26 + $0x48] sm:$0x1]  ;;  %v493_v25 = vrot.slane %v162_v62, 1 }
  0x21   : > { %1714 = vmatmul.mubr.msk.f32.gmra.mrb[6].mxu1 %vm216_vm0, %v2133_v45  ;;  %v489_v26 = vsel %vm483_vm1, %v487_v13, %v488_v17  ;;  %v494_v27 = vrot.slane %v163_v22, 1  ;;  %v496_v29 = vrot.slane %v164_v0, 1  ;;  %v497_v32 = vrot.slane %v165_v24, 1  ;;  %v167_v33 = vld [vmem:[%s2040_s26 + $0x58] sm:$0x1]  ;;  %v172_v40 = vld [vmem:[%s2040_s26 + $0x80] sm:$0xff] }
  0x22   : > { %1778 = vmatmul.mubr.msk.f32.gmra.mrb[2].mxu0 %vm216_vm0, %v930_v46  ;;  %1718 = vmatprep.mubr.msk.f32.mxu1 %vm216_vm0, %v156_v49  ;;  %v492_v31 = vsel %vm483_vm1, %v490_v18, %v491_v21  ;;  %v169_v35 = vld [vmem:[%s2040_s26 + $0x68] sm:$0x1]  ;;  %v499_v37 = vrot.slane %v166_v3, 1  ;;  %v500_v41 = vrot.slane %v167_v33, 1  ;;  %v171_v47 = vld [vmem:[%s2040_s26 + $0x78] sm:$0x1] }
  0x23   : > { %1780 = vmatprep.mubr.msk.f32.mxu0 %vm216_vm0, %v933_v50  ;;  %v495_v38 = vsel %vm483_vm1, %v493_v25, %v494_v27  ;;  %v498_v44 = vsel %vm483_vm1, %v496_v29, %v497_v32  ;;  %v503_v46 = vrot.slane %v169_v35, 1  ;;  %v505_v48 = vrot.slane %v170_v15, 1 }
  0x24   : > { %v501_v49 = vsel %vm483_vm1, %v499_v37, %v500_v41  ;;  %v506_v50 = vrot.slane %v171_v47, 1  ;;  %v1986_v11 = vmov (!%p1614_p4), 0.0  }
  0x25   : > { %1719 = vmatmul.mubr.msk.f32.vlgmr.msra.gmra.mrb[0].mxu1 %vm216_vm0, %v158_v55  ;;  %1427 = vst [vmem:[#allocation2] sm:$0x1] (!%p1614_p4), %v1986_v11  ;;  %1428 = vst [vmem:[#allocation4] sm:$0x1] (!%p1614_p4), %v1986_v11 }
  0x26   : > { %1781 = vmatmul.mubr.msk.f32.gmra.mrb[4].mxu0 %vm216_vm0, %v936_v56  ;;  %1731 = vmatpush3.msra.mxu1 %v2066_v12  ;;  %v215_v12 = vld [vmem:[%s2321_s1 + $0x40] sm:$0xff]  ;;  %v507_v53 = vsel %vm483_vm1, %v505_v48, %v506_v50 }
  0x27   : > { %1721 = vmatprep.mubr.msk.f32.mxu1 %vm216_vm0, %v160_v59  ;;  %1783 = vmatprep.mubr.msk.f32.mxu0 %vm216_vm0, %v939_v60 }
  0x28   : > { %1744 = vmatprep.subr.mxu1 %v210_v61 }
  0x29   : > { %1722 = vmatmul.mubr.msk.f32.gmra.mrb[2].mxu1 %vm216_vm0, %v162_v62 }
  0x2a   : > { %1784 = vmatmul.mubr.msk.f32.gmra.mrb[6].mxu0 %vm216_vm0, %v942_v63  ;;  %1724 = vmatprep.mubr.msk.f32.mxu1 %vm216_vm0, %v164_v0 }
  0x2b   : > { %1788 = vmatprep.mubr.msk.f32.mxu0 %vm216_vm0, %v158_v55 }
  0x2d   : > { %1725 = vmatmul.mubr.msk.f32.gmra.mrb[4].mxu1 %vm216_vm0, %v166_v3 }
  0x2e   : > { %1789 = vmatmul.mubr.msk.f32.vlgmr.msra.gmra.mrb[0].mxu0 %vm216_vm0, %v160_v59  ;;  %1727 = vmatprep.mubr.msk.f32.mxu1 %vm216_vm0, %v168_v5 }
  0x2f   : > { %1801 = vmatpush3.msra.mxu0 %v214_v42  ;;  %1791 = vmatprep.mubr.msk.f32.mxu0 %vm216_vm0, %v162_v62  ;;  %v502_v42 = vrot.slane %v168_v5, 1 }
  0x30   : > { %1814 = vmatprep.subr.mxu0 %v215_v12 }
  0x31   : > { %1728 = vmatmul.mubr.msk.f32.gmra.mrb[6].mxu1 %vm216_vm0, %v170_v15  ;;  %v504_v52 = vsel %vm483_vm1, %v502_v42, %v503_v46 }
  0x32   : > { %1792 = vmatmul.mubr.msk.f32.gmra.mrb[2].mxu0 %vm216_vm0, %v164_v0  ;;  %1732 = vmatprep.mubr.msk.f32.mxu1 %vm216_vm0, %v486_v20 }
  0x33   : > { %1794 = vmatprep.mubr.msk.f32.mxu0 %vm216_vm0, %v166_v3 }
  0x35   : > { %1733 = vmatmul.mubr.msk.f32.vlgmr.msra.gmra.mrb[0].mxu1 %vm216_vm0, %v489_v26 }
  0x36   : > { %1795 = vmatmul.mubr.msk.f32.gmra.mrb[4].mxu0 %vm216_vm0, %v168_v5  ;;  %1745 = vmatpush3.msra.mxu1 %v210_v61 }
  0x37   : > { %1735 = vmatprep.mubr.msk.f32.mxu1 %vm216_vm0, %v492_v31  ;;  %1797 = vmatprep.mubr.msk.f32.mxu0 %vm216_vm0, %v170_v15 }
  0x38   : > { %1828 = vmatprep.subr.mxu1 %v2025_v1 }
  0x39   : > { %1736 = vmatmul.mubr.msk.f32.gmra.mrb[2].mxu1 %vm216_vm0, %v495_v38 }
  0x3a   : > { %1798 = vmatmul.mubr.msk.f32.gmra.mrb[6].mxu0 %vm216_vm0, %v172_v40  ;;  %1738 = vmatprep.mubr.msk.f32.mxu1 %vm216_vm0, %v498_v44 }
  0x3b   : > { %1802 = vmatprep.mubr.msk.f32.mxu0 %vm216_vm0, %v2045_v6  ;;  %v182_v6 = vld [vmem:[%s2040_s26 + $0x110] sm:$0xff] }
  0x3d   : > { %1739 = vmatmul.mubr.msk.f32.gmra.mrb[4].mxu1 %vm216_vm0, %v501_v49 }
  0x3e   : > { %1803 = vmatmul.mubr.msk.f32.vlgmr.msra.gmra.mrb[0].mxu0 %vm216_vm0, %v2051_v8  ;;  %1741 = vmatprep.mubr.msk.f32.mxu1 %vm216_vm0, %v504_v52  ;;  %v173_v8 = vld [vmem:[%s2040_s26 + $0x88] sm:$0x1] }
  0x3f   : > { %1815 = vmatpush3.msra.mxu0 %v215_v12  ;;  %1805 = vmatprep.mubr.msk.f32.mxu0 %vm216_vm0, %v2058_v10  ;;  %v1305_v10 = vrot.slane %v172_v40, 1 }
  0x41   : > { %1742 = vmatmul.mubr.msk.f32.gmra.mrb[6].mxu1 %vm216_vm0, %v507_v53 }
  0x42   : > { %1806 = vmatmul.mubr.msk.f32.gmra.mrb[2].mxu0 %vm216_vm0, %v2077_v16  ;;  %1746 = vmatprep.mubr.msk.f32.mxu1 %vm216_vm0, %v2070_v14  ;;  %v204_v14 = vld [vmem:[%s2040_s26 + $0x200] sm:$0xff]  ;;  %v1306_v16 = vrot.slane %v173_v8, 1 }
  0x43   : > { %1808 = vmatprep.mubr.msk.f32.mxu0 %vm216_vm0, %v2103_v30 }
  0x45   : > { %1747 = vmatmul.mubr.msk.f32.vlgmr.msra.gmra.mrb[0].mxu1 %vm216_vm0, %v2081_v19  ;;  %v205_v19 = vld [vmem:[%s2040_s26 + $0x210] sm:$0xff] }
  0x46   : > { %1809 = vmatmul.mubr.msk.f32.gmra.mrb[4].mxu0 %vm216_vm0, %v2112_v36  ;;  %1829 = vmatpush3.msra.mxu1 %v2025_v1  ;;  %v203_v1 = vld [vmem:[%s2040_s26 + $0x1f0] sm:$0xff] }
  0x47   : > { %1749 = vmatprep.mubr.msk.f32.mxu1 %vm216_vm0, %v2086_v23  ;;  %1811 = vmatprep.mubr.msk.f32.mxu0 %vm216_vm0, %v2133_v45  ;;  %v206_v23 = vld [vmem:[%s2040_s26 + $0x220] sm:$0xff] }
  0x49   : > { %1750 = vmatmul.mubr.msk.f32.gmra.mrb[2].mxu1 %vm216_vm0, %v2096_v28  ;;  %v1307_v28 = vsel %vm483_vm1, %v1305_v10, %v1306_v16 }
  0x4a   : > { %1812 = vmatmul.mubr.msk.f32.gmra.mrb[6].mxu0 %vm216_vm0, %v182_v6  ;;  %1752 = vmatprep.mubr.msk.f32.mxu1 %vm216_vm0, %v2108_v34 }
  0x4b   : > { %1816 = vmatprep.mubr.msk.f32.mxu0 %vm216_vm0, %v489_v26 }
  0x4d   : > { %1753 = vmatmul.mubr.msk.f32.gmra.mrb[4].mxu1 %vm216_vm0, %v2116_v39 }
  0x4e   : > { %1817 = vmatmul.mubr.msk.f32.vlgmr.msra.gmra.mrb[0].mxu0 %vm216_vm0, %v492_v31  ;;  %1755 = vmatprep.mubr.msk.f32.mxu1 %vm216_vm0, %v2127_v43 }
  0x4f   : > { %1819 = vmatprep.mubr.msk.f32.mxu0 %vm216_vm0, %v495_v38 }
  0x51   : > { %1756 = vmatmul.mubr.msk.f32.gmra.mrb[6].mxu1 %vm216_vm0, %v2141_v51 }
  0x52   : > { %1820 = vmatmul.mubr.msk.f32.gmra.mrb[2].mxu0 %vm216_vm0, %v498_v44  ;;  %1766 = vmatprep.mubr.msk.f32.mxu1 %vm216_vm0, %v203_v1 }
  0x53   : > { %1822 = vmatprep.mubr.msk.f32.mxu0 %vm216_vm0, %v501_v49 }
  0x55   : > { %1767 = vmatmul.mubr.msk.f32.vlgmr.msra.gmra.mrb[4].mxu1 %vm216_vm0, %v204_v14 }
  0x56   : > { %1823 = vmatmul.mubr.msk.f32.gmra.mrb[4].mxu0 %vm216_vm0, %v504_v52  ;;  %1769 = vmatprep.mubr.msk.f32.mxu1 %vm216_vm0, %v205_v19 }
  0x57   : > { %1825 = vmatprep.mubr.msk.f32.mxu0 %vm216_vm0, %v507_v53 }
  0x59   : > { %1770 = vmatmul.mubr.msk.f32.gmra.mrb[6].mxu1 %vm216_vm0, %v206_v23 }
  0x5a   : > { %1826 = vmatmul.mubr.msk.f32.gmra.mrb[6].mxu0 %vm216_vm0, %v1307_v28 }
 0x118   : > { %v1748_v30 = vpop.f32.mrb[0].mxu1 }
 0x119   : > { %v727_v34 = vpop.f32.mrb[1].mxu1 }
 0x11c   : > { %v1751_v36 = vpop.f32.mrb[2].mxu1 }
 0x11d   : > { %v737_v39 = vpop.f32.mrb[3].mxu1 }
 0x121   : > { %v1818_v43 = vpop.f32.mrb[0].mxu0 }
 0x122   : > { %v1830_v45 = vadd.f32 %v1818_v43, %v1748_v30  ;;  %v1376_v51 = vpop.f32.mrb[1].mxu0 }
 0x123   : > { %v1831_v54 = vadd.f32 %v1376_v51, %v727_v34 }
 0x125   : > { %v1821_v55 = vpop.f32.mrb[2].mxu0 }
 0x126   : > { %v1832_v56 = vadd.f32 %v1821_v55, %v1751_v36  ;;  %v1386_v57 = vpop.f32.mrb[3].mxu0 }
 0x127   : > { %v1833_v58 = vadd.f32 %v1386_v57, %v737_v39 }
 0x128   : > { %v1768_v59 = vpop.f32.mrb[4].mxu1 }
 0x129   : > { %v1824_v60 = vpop.f32.mrb[4].mxu0  ;;  %v884_v62 = vpop.f32.mrb[5].mxu1  ;;  %1426 = sbr.rel (%p1614_p4) target bundleno = 304 (0x130), region = 32 }
 0x12a   : > { %v1834_v61 = vadd.f32 %v1824_v60, %v1768_v59  ;;  %v1396_v63 = vpop.f32.mrb[5].mxu0 }
 0x12b   : > { %v1835_v0 = vadd.f32 %v1396_v63, %v884_v62 }
 0x12c   : > { %v1771_v2 = vpop.f32.mrb[6].mxu1 }
 0x12d   : > { %v1827_v3 = vpop.f32.mrb[6].mxu0  ;;  %v894_v5 = vpop.f32.mrb[7].mxu1 }
 0x12e   : > { %v1836_v4 = vadd.f32 %v1827_v3, %v1771_v2  ;;  %v1406_v7 = vpop.f32.mrb[7].mxu0 }
 0x12f   : > { %v1837_v9 = vadd.f32 %v1406_v7, %v894_v5 }
 0x130 PF: > { %v1430_v12 = vadd.f32 %v1831_v54, %v1830_v45  ;;  %v1446_v13 = vmul.f32 %v1831_v54, %v1831_v54  ;;  %v1447_v15 = vmul.f32 %v1830_v45, %v1830_v45  ;;  %v1448_v17 = vmul.f32 %v1833_v58, %v1833_v58  ;;  %v1429_v1 = vld [vmem:[#allocation2] sm:$0x1]  ;;  %s1987_s10 = smov [#allocation2]   ;;  %v1445_v14 = vld [vmem:[#allocation4] sm:$0x1]  ;;  %p1903_p5 = scmp.eq.s32.totalorder %s2015_s13, 1 }
 0x131   : > { %v1449_v20 = vmul.f32 %v1832_v56, %v1832_v56  ;;  %v1450_v24 = vmul.f32 %v1835_v0, %v1835_v0  ;;  %v1451_v27 = vmul.f32 %v1834_v61, %v1834_v61  ;;  %v1452_v32 = vmul.f32 %v1837_v9, %v1837_v9  ;;  %s1476_s11 = sshll.u32 %s1987_s10, 4  ;;  %s1988_s14 = smov [#allocation4]   ;;  %s1477_s11 = int_to_ptr.vmem [resolvable:$true] %s1476_s11 }
 0x132   : > { %v1431_v18 = vadd.f32 %v1833_v58, %v1430_v12  ;;  %v1454_v21 = vadd.f32 %v1447_v15, %v1446_v13  ;;  %v1453_v37 = vmul.f32 %v1836_v4, %v1836_v4  ;;  %s1487_s15 = sshll.u32 %s1988_s14, 4  ;;  %s1918_s16 = scalar_lea.vmem %s1477_s11, 16  ;;  %s2265_s15 = int_to_ptr.vmem [resolvable:$true] %s1487_s15 }
 0x133   : > { %p1919_p6 = scmp.ne.s32.totalorder %s1477_s11, %s1918_s16  ;;  %s1924_s17 = scalar_lea.vmem %s1477_s11, 32 }
 0x134   : > { %v1432_v22 = vadd.f32 %v1832_v56, %v1431_v18  ;;  %v1455_v25 = vadd.f32 %v1454_v21, %v1448_v17  ;;  %p1925_p9 = scmp.lt.s32.totalorder %s1477_s11, %s1477_s11  ;;  %p1926_p10 = scmp.lt.s32.totalorder %s1924_s17, %s1918_s16 }
 0x135   : > { %p1920_p7 = pnand %p1919_p6, %p1903_p5 }
 0x136   : > { %v1433_v26 = vadd.f32 %v1835_v0, %v1432_v22  ;;  %v1456_v29 = vadd.f32 %v1455_v25, %v1449_v20  ;;  %p1927_p11 = por %p1926_p10, %p1925_p9 }
 0x137   : > { %p1921_p8 = pneg %p1920_p7 }
 0x138   : > { %v1434_v31 = vadd.f32 %v1834_v61, %v1433_v26  ;;  %v1457_v33 = vadd.f32 %v1456_v29, %v1450_v24 }
 0x139   : > { %p1928_p12 = pnand %p1927_p11, %p1921_p8 }
 0x13a   : > { %v1435_v35 = vadd.f32 %v1837_v9, %v1434_v31  ;;  %v1458_v38 = vadd.f32 %v1457_v33, %v1451_v27 }
 0x13c   : > { %v1436_v40 = vadd.f32 %v1836_v4, %v1435_v35  ;;  %v1459_v41 = vadd.f32 %v1458_v38, %v1452_v32 }
 0x13e   : > { %v1437_v42 = vrot.slane %v1436_v40, 4  ;;  %v1460_v44 = vadd.f32 %v1459_v41, %v1453_v37 }
 0x140   : > { %v1438_v46 = vadd.f32 %v1437_v42, %v1436_v40  ;;  %v1461_v47 = vrot.slane %v1460_v44, 4 }
 0x142   : > { %v1439_v48 = vrot.slane %v1438_v46, 2  ;;  %v1462_v49 = vadd.f32 %v1461_v47, %v1460_v44 }
 0x144   : > { %v1440_v50 = vadd.f32 %v1439_v48, %v1438_v46  ;;  %v1463_v52 = vrot.slane %v1462_v49, 2 }
 0x146   : > { %v1441_v53 = vrot.slane %v1440_v50, 1  ;;  %v1464_v6 = vadd.f32 %v1463_v52, %v1462_v49 }
 0x148   : > { %v1442_v8 = vadd.f32 %v1441_v53, %v1440_v50  ;;  %v1465_v10 = vrot.slane %v1464_v6, 1 }
 0x14a   : > { %v1443_v16 = vadd.f32 %v1442_v8, %v1429_v1  ;;  %v1466_v19 = vadd.f32 %v1465_v10, %v1464_v6 }
 0x14c   : > { %1444 = vst [vmem:[#allocation2] sm:$0x1] %v1443_v16  ;;  %v1467_v23 = vadd.f32 %v1466_v19, %v1445_v14 }
 0x14d   : > { %1931 = shalt.err (!%p1928_p12)
}
 0x14e   : > { %s1932_s20 = scalar_lea.hbm %s2322_s2, 16 }
 0x14f   : > { %p1933_p13 = scmp.ne.s32.totalorder %s2322_s2, %s1932_s20  ;;  %p1938_p2 = scmp.lt.u32.totalorder %s1932_s20, %s2322_s2 }
 0x151   : > { %p1934_p0 = pnand %p1933_p13, %p1903_p5 }
 0x153   : > { %p1935_p1 = pneg %p1934_p0 }
 0x155   : > { %p1940_p3 = pnand %p1938_p2, %p1935_p1 }
 0x157   : > { %1943 = shalt.err (!%p1940_p3)
}
 0x158   : > { %1896 = dma.vmem_to_hbm [thread:$0]  (%p1903_p5), %s1477_s11, 16, %s2322_s2, [#allocation3]   ;;  %1468 = vst [vmem:[#allocation4] sm:$0x1] %v1467_v23 }
 0x159   : > { %s1944_s27 = scalar_lea.vmem %s2265_s15, 16  ;;  %s1950_s28 = scalar_lea.vmem %s2265_s15, 32 }
 0x15a   : > { %p1945_p4 = scmp.ne.s32.totalorder %s2265_s15, %s1944_s27  ;;  %p1951_p8 = scmp.lt.s32.totalorder %s2265_s15, %s2265_s15 }
 0x15b   : > { %p1952_p9 = scmp.lt.s32.totalorder %s1950_s28, %s1944_s27 }
 0x15c   : > { %p1946_p6 = pnand %p1945_p4, %p1903_p5 }
 0x15d   : > { %p1953_p10 = por %p1952_p9, %p1951_p8 }
 0x15e   : > { %p1947_p7 = pneg %p1946_p6 }
 0x160   : > { %p1954_p11 = pnand %p1953_p10, %p1947_p7 }
 0x162   : > { %1957 = shalt.err (!%p1954_p11)
}
 0x163   : > { %s1958_s4 = scalar_lea.hbm %s2323_s3, 16 }
 0x164   : > { %p1959_p12 = scmp.ne.s32.totalorder %s2323_s3, %s1958_s4  ;;  %p1964_p1 = scmp.lt.u32.totalorder %s1958_s4, %s2323_s3 }
 0x166   : > { %p1960_p13 = pnand %p1959_p12, %p1903_p5 }
 0x168   : > { %p1961_p0 = pneg %p1960_p13 }
 0x16a   : > { %p1966_p2 = pnand %p1964_p1, %p1961_p0 }
 0x16c   : > { %1969 = shalt.err (!%p1966_p2)
}
 0x16d   : > { %1898 = dma.vmem_to_hbm [thread:$0]  (%p1903_p5), %s2265_s15, 16, %s2323_s3, [#allocation5]  }
 0x16e   : > { %1975 = dma.done.wait (%p1903_p5), [#allocation3], 16  }
 0x16f   : > { %1977 = vsyncadd (%p1903_p5), [#allocation3], 4294967280 }
 0x170   : > { %1979 = dma.done.wait (%p1903_p5), [#allocation5], 16  }
 0x171   : > { %1981 = vsyncadd (%p1903_p5), [#allocation5], 4294967280 }
 0x172 PF: > { %s16_s12 = sadd.s32 1, %s1984_s12  }
 0x173   : > { %p13_p3 = scmp.ge.s32.totalorder %s16_s12, 4  }
 0x175   :  { %15 = sbr.rel (!%p13_p3) target bundleno = 2 (0x2), region = 67 }
 0x17c   :  { %1504 = vsyncpa [#allocation3], 1 }
 0x17d   :  { %1506 = vsyncpa [#allocation3 + $0x1], 1 }
 0x17e   :  { %1507 = vsyncpa [#allocation5], 1 }

</bundles_post_ra>
